<compile_context>
chip_gen: v6e
topology: v6e:2x2x1
jax: 0.10.0
libtpu: 0.0.40
codegen_flags: <defaults>
</compile_context>

<pallas_src>
import jax
import jax.numpy as jnp
from jax.experimental import pallas as pl
from jax.experimental.pallas import tpu as pltpu

EPS = 1e-5


def _round_up(a, b):
    return (a + b - 1) // b * b


def _transition_kernel(x_ref, gamma_ref, beta_ref, wab_ref, wo_ref, o_ref,
                       xn_ref, acc_ref):
    # x_ref:   (tm, E)      row tile
    # gamma/beta: (1, E)
    # wab_ref: (E, 2*th)    [Wa_chunk | Wb_chunk] for this H chunk
    # wo_ref:  (th, E)      Wo chunk for this H chunk
    # o_ref:   (tm, E)      output row tile (written on last H step)
    # xn_ref:  (tm, E)      cached LayerNorm output (compute dtype)
    # acc_ref: (tm, E) f32  accumulator across H chunks
    j = pl.program_id(1)

    @pl.when(j == 0)
    def _():
        # LayerNorm over last dim (nn.LayerNorm(embedding_size), eps=1e-5); f32 stats.
        x = x_ref[...].astype(jnp.float32)
        mean = jnp.mean(x, axis=-1, keepdims=True)
        centered = x - mean
        var = jnp.mean(centered * centered, axis=-1, keepdims=True)
        xn = centered * jax.lax.rsqrt(var + EPS)
        xn = xn * gamma_ref[...].astype(jnp.float32) + beta_ref[...].astype(jnp.float32)
        xn_ref[...] = xn.astype(xn_ref.dtype)
        acc_ref[...] = jnp.zeros_like(acc_ref)

    xn = xn_ref[...]
    # One wide matmul for this H chunk: (tm, E) @ (E, 2*th) -> (tm, 2*th).
    ab = jnp.dot(xn, wab_ref[...], preferred_element_type=jnp.float32)
    th = ab.shape[-1] // 2
    a = ab[:, :th]
    b = ab[:, th:]
    h = (a * jax.nn.sigmoid(a)) * b                     # SwiGLU chunk, f32

    # Project this chunk back and accumulate: (tm, th) @ (th, E).
    acc_ref[...] += jnp.dot(h.astype(wo_ref.dtype), wo_ref[...],
                            preferred_element_type=jnp.float32)

    @pl.when(j == pl.num_programs(1) - 1)
    def _():
        o_ref[...] = acc_ref[...].astype(o_ref.dtype)


def transition(x, gamma, beta, wa, wb, wo, *, tm=256, th=None):
    """x: [..., E]; gamma/beta: [E]; wa/wb: [E, H]; wo: [H, E].

    Weights use the [in, out] (already-transposed vs PyTorch) convention, so the
    kernel computes x @ Wa etc. directly.
    """
    orig_shape = x.shape
    E = orig_shape[-1]
    H = wa.shape[1]

    # Pick the hidden-chunk size: multiple of 128 lanes when possible.
    if th is None:
        for cand in (512, 256, 128):
            if H % cand == 0:
                th = cand
                break
        else:
            th = H
    assert H % th == 0
    num_h = H // th

    x2d = x.reshape(-1, E)
    N = x2d.shape[0]

    # Row tile: large by default, shrunk (and 8-aligned) for small inputs.
    tm = max(8, min(_round_up(tm, 8), _round_up(N, 8)))
    n_pad = _round_up(N, tm)
    if n_pad != N:
        x2d = jnp.pad(x2d, ((0, n_pad - N), (0, 0)))

    gamma2d = gamma.reshape(1, E)
    beta2d = beta.reshape(1, E)

    # Fuse Wa/Wb per H-chunk: chunk j of wab = [Wa[:, j*th:(j+1)*th] | Wb[:, ...]].
    wab = jnp.concatenate(
        [wa.reshape(E, num_h, th), wb.reshape(E, num_h, th)], axis=2
    ).reshape(E, num_h * 2 * th)

    compute_dtype = wab.dtype

    out = pl.pallas_call(
        _transition_kernel,
        out_shape=jax.ShapeDtypeStruct((n_pad, E), x.dtype),
        grid_spec=pltpu.PrefetchScalarGridSpec(
            num_scalar_prefetch=0,
            grid=(n_pad // tm, num_h),
            in_specs=[
                pl.BlockSpec((tm, E), lambda i, j: (i, 0)),        # x rows
                pl.BlockSpec((1, E), lambda i, j: (0, 0)),         # gamma
                pl.BlockSpec((1, E), lambda i, j: (0, 0)),         # beta
                pl.BlockSpec((E, 2 * th), lambda i, j: (0, j)),    # [Wa|Wb] chunk
                pl.BlockSpec((th, E), lambda i, j: (j, 0)),        # Wo chunk
            ],
            out_specs=pl.BlockSpec((tm, E), lambda i, j: (i, 0)),
            scratch_shapes=[
                pltpu.VMEM((tm, E), compute_dtype),   # cached LayerNorm output
                pltpu.VMEM((tm, E), jnp.float32),     # f32 accumulator
            ],
        ),
        compiler_params=pltpu.CompilerParams(
            dimension_semantics=("parallel", "arbitrary"),
            vmem_limit_bytes=64 * 1024 * 1024,
        ),
    )(x2d, gamma2d, beta2d, wab, wo)

    if n_pad != N:
        out = out[:N]
    return out.reshape(orig_shape)


def _reference(x, gamma, beta, wa, wb, wo):
    x = x.astype(jnp.float32)
    mean = jnp.mean(x, axis=-1, keepdims=True)
    var = jnp.mean((x - mean) ** 2, axis=-1, keepdims=True)
    xn = (x - mean) / jnp.sqrt(var + EPS) * gamma + beta
    a = xn @ wa
    b = xn @ wb
    h = jax.nn.silu(a) * b
    return h @ wo


if __name__ == "__main__":
    # Small shapes: batch=2, seq=8, embedding_size=32, transition_multiplier=4
    batch, seq, E, mult = 2, 8, 32, 4
    H = E * mult

    key = jax.random.PRNGKey(0)
    kx, ka, kb, ko, kg, kbeta = jax.random.split(key, 6)

    x = jax.random.normal(kx, (batch, seq, E), dtype=jnp.float32)

    # Deterministic parameter init (synthetic; PyTorch layout transposed to [in, out]).
    wa = jax.random.normal(ka, (E, H), dtype=jnp.float32) * 0.05
    wb = jax.random.normal(kb, (E, H), dtype=jnp.float32) * 0.05
    wo = jax.random.normal(ko, (H, E), dtype=jnp.float32) * 0.05
    gamma = 1.0 + 0.1 * jax.random.normal(kg, (E,), dtype=jnp.float32)
    beta = 0.1 * jax.random.normal(kbeta, (E,), dtype=jnp.float32)

    out = transition(x, gamma, beta, wa, wb, wo)
    out = jax.block_until_ready(out)

    ref = _reference(x, gamma, beta, wa, wb, wo)
    assert out.shape == x.shape
    assert jnp.allclose(out, ref, atol=1e-4, rtol=1e-4), "mismatch vs reference"

    print("KERNEL_OK")
</pallas_src>

<mosaic_0001>
module attributes {stable_mosaic.version = 11 : i64} {
  func.func @_transition_kernel(%arg0: i32, %arg1: i32, %arg2: memref<16x32xf32, #tpu.memory_space<vmem>>, %arg3: memref<1x32xf32, #tpu.memory_space<vmem>>, %arg4: memref<1x32xf32, #tpu.memory_space<vmem>>, %arg5: memref<32x256xf32, #tpu.memory_space<vmem>>, %arg6: memref<128x32xf32, #tpu.memory_space<vmem>>, %arg7: memref<16x32xf32, #tpu.memory_space<vmem>>, %arg8: memref<16x32xf32, #tpu.memory_space<vmem>>, %arg9: memref<16x32xf32, #tpu.memory_space<vmem>>) attributes {dimension_semantics = [#tpu.dimension_semantics<parallel>, #tpu.dimension_semantics<arbitrary>], iteration_bounds = array<i64: 1, 1>, scalar_prefetch = 0 : i64, scratch_operands = 2 : i64, tpu.core_type = #tpu.core_type<tc>, window_params = [{transform_indices = @transform_0, window_bounds = array<i64: 16, 32>}, {pipeline_mode = #tpu.pipeline_mode<synchronous>, transform_indices = @transform_1, window_bounds = array<i64: 1, 32>}, {pipeline_mode = #tpu.pipeline_mode<synchronous>, transform_indices = @transform_2, window_bounds = array<i64: 1, 32>}, {transform_indices = @transform_3, window_bounds = array<i64: 32, 256>}, {transform_indices = @transform_4, window_bounds = array<i64: 128, 32>}, {transform_indices = @transform_5, window_bounds = array<i64: 16, 32>}]} {
    %c0_i32 = arith.constant 0 : i32
    %0 = arith.cmpi eq, %arg1, %c0_i32 : i32
    %1 = arith.extui %0 : i1 to i32
    %c0_i32_0 = arith.constant 0 : i32
    %2 = arith.cmpi ne, %1, %c0_i32_0 : i32
    scf.if %2 {
      %c0_14 = arith.constant 0 : index
      %c0_15 = arith.constant 0 : index
      %23 = vector.load %arg2[%c0_14, %c0_15] : memref<16x32xf32, #tpu.memory_space<vmem>>, vector<16x32xf32>
      %cst_16 = arith.constant dense<0.000000e+00> : vector<16xf32>
      %24 = vector.multi_reduction <add>, %23, %cst_16 [1] : vector<16x32xf32> to vector<16xf32>
      %25 = vector.shape_cast %24 : vector<16xf32> to vector<16x1xf32>
      %cst_17 = arith.constant 3.200000e+01 : f32
      %26 = vector.broadcast %cst_17 : f32 to vector<16x1xf32>
      %27 = arith.divf %25, %26 : vector<16x1xf32>
      %28 = vector.broadcast %27 : vector<16x1xf32> to vector<16x32xf32>
      %29 = arith.subf %23, %28 : vector<16x32xf32>
      %30 = arith.mulf %29, %29 : vector<16x32xf32>
      %cst_18 = arith.constant dense<0.000000e+00> : vector<16xf32>
      %31 = vector.multi_reduction <add>, %30, %cst_18 [1] : vector<16x32xf32> to vector<16xf32>
      %32 = vector.shape_cast %31 : vector<16xf32> to vector<16x1xf32>
      %cst_19 = arith.constant 3.200000e+01 : f32
      %33 = vector.broadcast %cst_19 : f32 to vector<16x1xf32>
      %34 = arith.divf %32, %33 : vector<16x1xf32>
      %cst_20 = arith.constant 9.99999974E-6 : f32
      %35 = vector.broadcast %cst_20 : f32 to vector<16x1xf32>
      %36 = arith.addf %34, %35 : vector<16x1xf32>
      %37 = math.rsqrt %36 : vector<16x1xf32>
      %38 = vector.broadcast %37 : vector<16x1xf32> to vector<16x32xf32>
      %39 = arith.mulf %29, %38 : vector<16x32xf32>
      %c0_21 = arith.constant 0 : index
      %c0_22 = arith.constant 0 : index
      %40 = vector.load %arg3[%c0_21, %c0_22] : memref<1x32xf32, #tpu.memory_space<vmem>>, vector<1x32xf32>
      %41 = vector.broadcast %40 : vector<1x32xf32> to vector<16x32xf32>
      %42 = arith.mulf %39, %41 : vector<16x32xf32>
      %c0_23 = arith.constant 0 : index
      %c0_24 = arith.constant 0 : index
      %43 = vector.load %arg4[%c0_23, %c0_24] : memref<1x32xf32, #tpu.memory_space<vmem>>, vector<1x32xf32>
      %44 = vector.broadcast %43 : vector<1x32xf32> to vector<16x32xf32>
      %45 = arith.addf %42, %44 : vector<16x32xf32>
      %c0_25 = arith.constant 0 : index
      %c0_26 = arith.constant 0 : index
      %46 = vector.load %arg8[%c0_25, %c0_26] : memref<16x32xf32, #tpu.memory_space<vmem>>, vector<16x32xf32>
      tpu.vector_store %arg8[%c0_25, %c0_26], %45 {strides = array<i32>} : memref<16x32xf32, #tpu.memory_space<vmem>>, vector<16x32xf32>,
      %cst_27 = arith.constant 0.000000e+00 : f32
      %47 = vector.broadcast %cst_27 : f32 to vector<16x32xf32>
      %c0_28 = arith.constant 0 : index
      %c0_29 = arith.constant 0 : index
      %48 = vector.load %arg9[%c0_28, %c0_29] : memref<16x32xf32, #tpu.memory_space<vmem>>, vector<16x32xf32>
      tpu.vector_store %arg9[%c0_28, %c0_29], %47 {strides = array<i32>} : memref<16x32xf32, #tpu.memory_space<vmem>>, vector<16x32xf32>,
    } else {
    }
    %c0 = arith.constant 0 : index
    %c0_1 = arith.constant 0 : index
    %3 = vector.load %arg8[%c0, %c0_1] : memref<16x32xf32, #tpu.memory_space<vmem>>, vector<16x32xf32>
    %c0_2 = arith.constant 0 : index
    %c0_3 = arith.constant 0 : index
    %4 = vector.load %arg5[%c0_2, %c0_3] : memref<32x256xf32, #tpu.memory_space<vmem>>, vector<32x256xf32>
    %cst = arith.constant dense<0.000000e+00> : vector<16x256xf32>
    %5 = tpu.matmul %3, %4, %cst {dimension_numbers = #tpu.dot_dimension_numbers<[1], [0], [0], [1], [0, 0, 1, 1], [], []>} : vector<16x32xf32>, vector<32x256xf32>, vector<16x256xf32> -> vector<16x256xf32>
    %6 = vector.extract_strided_slice %5 {offsets = [0, 0], sizes = [16, 128], strides = [1, 1]} : vector<16x256xf32> to vector<16x128xf32>
    %7 = vector.extract_strided_slice %5 {offsets = [0, 128], sizes = [16, 128], strides = [1, 1]} : vector<16x256xf32> to vector<16x128xf32>
    %8 = arith.negf %6 : vector<16x128xf32>
    %9 = math.exp %8 : vector<16x128xf32>
    %cst_4 = arith.constant 1.000000e+00 : f32
    %10 = vector.broadcast %cst_4 : f32 to vector<16x128xf32>
    %11 = arith.addf %10, %9 : vector<16x128xf32>
    %12 = arith.divf %10, %11 : vector<16x128xf32>
    %13 = arith.mulf %6, %12 : vector<16x128xf32>
    %14 = arith.mulf %13, %7 : vector<16x128xf32>
    %c0_5 = arith.constant 0 : index
    %c0_6 = arith.constant 0 : index
    %15 = vector.load %arg9[%c0_5, %c0_6] : memref<16x32xf32, #tpu.memory_space<vmem>>, vector<16x32xf32>
    %c0_7 = arith.constant 0 : index
    %c0_8 = arith.constant 0 : index
    %16 = vector.load %arg6[%c0_7, %c0_8] : memref<128x32xf32, #tpu.memory_space<vmem>>, vector<128x32xf32>
    %cst_9 = arith.constant dense<0.000000e+00> : vector<16x32xf32>
    %17 = tpu.matmul %14, %16, %cst_9 {dimension_numbers = #tpu.dot_dimension_numbers<[1], [0], [0], [1], [0, 0, 1, 1], [], []>} : vector<16x128xf32>, vector<128x32xf32>, vector<16x32xf32> -> vector<16x32xf32>
    %18 = arith.addf %15, %17 : vector<16x32xf32>
    %c0_10 = arith.constant 0 : index
    %c0_11 = arith.constant 0 : index
    %19 = vector.load %arg9[%c0_10, %c0_11] : memref<16x32xf32, #tpu.memory_space<vmem>>, vector<16x32xf32>
    tpu.vector_store %arg9[%c0_10, %c0_11], %18 {strides = array<i32>} : memref<16x32xf32, #tpu.memory_space<vmem>>, vector<16x32xf32>,
    %c0_i32_12 = arith.constant 0 : i32
    %20 = arith.cmpi eq, %arg1, %c0_i32_12 : i32
    %21 = arith.extui %20 : i1 to i32
    %c0_i32_13 = arith.constant 0 : i32
    %22 = arith.cmpi ne, %21, %c0_i32_13 : i32
    scf.if %22 {
      %c0_14 = arith.constant 0 : index
      %c0_15 = arith.constant 0 : index
      %23 = vector.load %arg9[%c0_14, %c0_15] : memref<16x32xf32, #tpu.memory_space<vmem>>, vector<16x32xf32>
      %c0_16 = arith.constant 0 : index
      %c0_17 = arith.constant 0 : index
      %24 = vector.load %arg7[%c0_16, %c0_17] : memref<16x32xf32, #tpu.memory_space<vmem>>, vector<16x32xf32>
      tpu.vector_store %arg7[%c0_16, %c0_17], %23 {strides = array<i32>} : memref<16x32xf32, #tpu.memory_space<vmem>>, vector<16x32xf32>,
    } else {
    }
    return
  }
  func.func @transform_0(%arg0: i32, %arg1: i32) -> (i32, i32) {
    %c0_i32 = arith.constant 0 : i32
    %c0_i32_0 = arith.constant 0 : i32
    return %arg0, %c0_i32 : i32, i32
  }
  func.func @transform_1(%arg0: i32, %arg1: i32) -> (i32, i32) {
    %c0_i32 = arith.constant 0 : i32
    %c0_i32_0 = arith.constant 0 : i32
    %c0_i32_1 = arith.constant 0 : i32
    return %c0_i32, %c0_i32_0 : i32, i32
  }
  func.func @transform_2(%arg0: i32, %arg1: i32) -> (i32, i32) {
    %c0_i32 = arith.constant 0 : i32
    %c0_i32_0 = arith.constant 0 : i32
    %c0_i32_1 = arith.constant 0 : i32
    return %c0_i32, %c0_i32_0 : i32, i32
  }
  func.func @transform_3(%arg0: i32, %arg1: i32) -> (i32, i32) {
    %c0_i32 = arith.constant 0 : i32
    %c0_i32_0 = arith.constant 0 : i32
    return %c0_i32, %arg1 : i32, i32
  }
  func.func @transform_4(%arg0: i32, %arg1: i32) -> (i32, i32) {
    %c0_i32 = arith.constant 0 : i32
    %c0_i32_0 = arith.constant 0 : i32
    return %arg1, %c0_i32 : i32, i32
  }
  func.func @transform_5(%arg0: i32, %arg1: i32) -> (i32, i32) {
    %c0_i32 = arith.constant 0 : i32
    %c0_i32_0 = arith.constant 0 : i32
    return %arg0, %c0_i32 : i32, i32
  }
}

</mosaic_0001>

<bundles_post_ra>
// kernel: tpu_custom_call.1
= control target key start
LH: loop header
LB: loop body
LE: loop exit
PB: predicated region body
PF: predicated region fallthrough
CT: control target
= control target key end

     0   :  { %vm27_vm0 = vcmask 261120   ;;  %s539_s0 = inlined_call_operand.vmem [shape: f32[16,32], index: 0, kind: input, shape index: {}]   ;;  %s540_s1 = inlined_call_operand.vmem [shape: f32[1,32], index: 1, kind: input, shape index: {}]   ;;  %s541_s2 = inlined_call_operand.vmem [shape: f32[1,32], index: 2, kind: input, shape index: {}]   ;;  %s542_s3 = inlined_call_operand.vmem [shape: f32[32,256], index: 3, kind: input, shape index: {}]   ;;  %s543_s4 = inlined_call_operand.vmem [shape: f32[128,32], index: 4, kind: input, shape index: {}]   ;;  %s544_s5 = inlined_call_operand.hbm [shape: f32[16,32], index: 5, kind: output, shape index: {}]  }
   0x1   :  { %v25_v0 = vld [vmem:[%s539_s0] sm:$0xff]  ;;  %v26_v1 = vld [vmem:[%s539_s0 + $0x8] sm:$0xff] }
   0x2   :  { %10 = vsyncpa [#allocation5], 0  ;;  %v28_v2 = vsel %vm27_vm0, %v25_v0, 0.0  ;;  %v31_v3 = vsel %vm27_vm0, %v26_v1, 0.0  ;;  %v86_v14 = vld [vmem:[%s542_s3 + $0x38] sm:$0xff]  ;;  %v85_v15 = vld [vmem:[%s542_s3 + $0x30] sm:$0xff] }
   0x3   :  { %29 = vadd.xlane.f32.xlu0 %v28_v2  ;;  %118 = vmatprep.subr.mxu0 %v86_v14  ;;  %v84_v16 = vld [vmem:[%s542_s3 + $0x28] sm:$0xff]  ;;  %v83_v17 = vld [vmem:[%s542_s3 + $0x20] sm:$0xff]  ;;  %v82_v18 = vld [vmem:[%s542_s3 + $0x18] sm:$0xff]  ;;  %v404_v22 = vmov 0.0  }
   0x4   :  { %119 = vmatpush1.msra.mxu0 %v85_v15  ;;  %v81_v19 = vld [vmem:[%s542_s3 + $0x10] sm:$0xff]  ;;  %v80_v20 = vld [vmem:[%s542_s3 + $0x8] sm:$0xff]  ;;  %v79_v21 = vld [vmem:[%s542_s3] sm:$0xff]  ;;  %75 = vst.msk [vmem:[#allocation3] sm:$0xff] %vm27_vm0, %v404_v22  ;;  %158 = vmatprep.mubr.f32.mxu0 %v404_v22 }
   0x5   :  { %120 = vmatprep.subr.mxu0 %v84_v16  ;;  %76 = vst.msk [vmem:[#allocation3 + $0x8] sm:$0xff] %vm27_vm0, %v404_v22  ;;  %v307_v30 = vld [vmem:[%s540_s1] ss:$0 sm:$0xff]  ;;  %v204_v41 = vld [vmem:[%s543_s4 + $0x78] sm:$0xff]  ;;  %v203_v42 = vld [vmem:[%s543_s4 + $0x70] sm:$0xff] }
   0x6   :  { %121 = vmatpush1.msra.mxu0 %v83_v17  ;;  %v308_v32 = vld [vmem:[%s541_s2] ss:$0 sm:$0xff]  ;;  %331 = vmatprep.subr.mxu1 %v204_v41  ;;  %v202_v43 = vld [vmem:[%s543_s4 + $0x68] sm:$0xff]  ;;  %v200_v45 = vld [vmem:[%s543_s4 + $0x58] sm:$0xff] }
   0x7   :  { %32 = vadd.xlane.f32.xlu0 %v31_v3  ;;  %122 = vmatprep.subr.mxu0 %v82_v18  ;;  %v201_v44 = vld [vmem:[%s543_s4 + $0x60] sm:$0xff]  ;;  %v199_v46 = vld [vmem:[%s543_s4 + $0x50] sm:$0xff]  ;;  %v198_v47 = vld [vmem:[%s543_s4 + $0x48] sm:$0xff] }
   0x8   :  { %123 = vmatpush1.msra.mxu0 %v81_v19  ;;  %332 = vmatpush3.msra.mxu1 %v204_v41  ;;  %v197_v48 = vld [vmem:[%s543_s4 + $0x40] sm:$0xff]  ;;  %v196_v49 = vld [vmem:[%s543_s4 + $0x38] sm:$0xff]  ;;  %v195_v50 = vld [vmem:[%s543_s4 + $0x30] sm:$0xff] }
   0x9   :  { %124 = vmatprep.subr.mxu0 %v80_v20  ;;  %333 = vmatprep.subr.mxu1 %v203_v42  ;;  %v194_v51 = vld [vmem:[%s543_s4 + $0x28] sm:$0xff]  ;;  %v193_v52 = vld [vmem:[%s543_s4 + $0x20] sm:$0xff]  ;;  %v192_v53 = vld [vmem:[%s543_s4 + $0x18] sm:$0xff] }
   0xa   :  { %125 = vmatpush1.msra.mxu0 %v79_v21  ;;  %334 = vmatpush3.msra.mxu1 %v203_v42  ;;  %v191_v54 = vld [vmem:[%s543_s4 + $0x10] sm:$0xff]  ;;  %v190_v55 = vld [vmem:[%s543_s4 + $0x8] sm:$0xff]  ;;  %v189_v56 = vld [vmem:[%s543_s4] sm:$0xff]  ;;  %s405_s4 = smov [#allocation4]  }
   0xb   :  { %335 = vmatprep.subr.mxu1 %v202_v43  ;;  %s296_s16 = sshll.u32 %s405_s4, 4  ;;  %s297_s16 = int_to_ptr.vmem [resolvable:$true] %s296_s16 }
   0xc   :  { %336 = vmatpush3.msra.mxu1 %v202_v43  ;;  %s382_s17 = scalar_lea.vmem %s297_s16, 256  ;;  %p387_p1 = scmp.lt.s32.totalorder %s297_s16, %s297_s16 }
   0xd   :  { %337 = vmatprep.subr.mxu1 %v201_v44  ;;  %p383_p0 = scmp.ne.s32.totalorder %s297_s16, %s382_s17  ;;  %p388_p2 = scmp.lt.s32.totalorder %s382_s17, %s382_s17 }
   0xe   :  { %338 = vmatpush3.msra.mxu1 %v201_v44 }
   0xf   :  { %339 = vmatprep.subr.mxu1 %v200_v45  ;;  %p389_p3 = por %p388_p2, %p387_p1 }
  0x10   :  { %340 = vmatpush3.msra.mxu1 %v200_v45 }
  0x11   :  { %341 = vmatprep.subr.mxu1 %v199_v46  ;;  %p390_p4 = pnand %p389_p3, %p383_p0 }
  0x12   :  { %342 = vmatpush3.msra.mxu1 %v199_v46 }
  0x13   :  { %343 = vmatprep.subr.mxu1 %v198_v47 }
  0x14   :  { %344 = vmatpush3.msra.mxu1 %v198_v47 }
  0x15   :  { %345 = vmatprep.subr.mxu1 %v197_v48 }
  0x16   :  { %346 = vmatpush3.msra.mxu1 %v197_v48 }
  0x17   :  { %347 = vmatprep.subr.mxu1 %v196_v49 }
  0x18   :  { %348 = vmatpush3.msra.mxu1 %v196_v49 }
  0x19   :  { %349 = vmatprep.subr.mxu1 %v195_v50 }
  0x1a   :  { %350 = vmatpush3.msra.mxu1 %v195_v50 }
  0x1b   :  { %351 = vmatprep.subr.mxu1 %v194_v51 }
  0x1c   :  { %352 = vmatpush3.msra.mxu1 %v194_v51 }
  0x1d   :  { %353 = vmatprep.subr.mxu1 %v193_v52 }
  0x1e   :  { %354 = vmatpush3.msra.mxu1 %v193_v52 }
  0x1f   :  { %355 = vmatprep.subr.mxu1 %v192_v53 }
  0x20   :  { %356 = vmatpush3.msra.mxu1 %v192_v53 }
  0x21   :  { %357 = vmatprep.subr.mxu1 %v191_v54 }
  0x22   :  { %358 = vmatpush3.msra.mxu1 %v191_v54 }
  0x23   :  { %359 = vmatprep.subr.mxu1 %v190_v55 }
  0x24   :  { %360 = vmatpush3.msra.mxu1 %v190_v55 }
  0x25   :  { %361 = vmatprep.subr.mxu1 %v189_v56 }
  0x26   :  { %362 = vmatpush3.msra.mxu1 %v189_v56 }
  0x8c   :  { %v30_v4 = vpop.xlane.xlu0 %29 }
  0x8d   :  { %v35_v5 = vmul.f32 0.03125, %v30_v4 }
  0x8f   :  { %v37_v6 = vsub.f32 %v25_v0, %v35_v5 }
  0x90   :  { %v33_v7 = vpop.xlane.xlu0 %32 }
  0x91   :  { %v36_v8 = vmul.f32 0.03125, %v33_v7  ;;  %v39_v9 = vmul.f32 %v37_v6, %v37_v6 }
  0x93   :  { %v38_v10 = vsub.f32 %v26_v1, %v36_v8  ;;  %v41_v11 = vsel %vm27_vm0, %v39_v9, 0.0  ;;  %v188_v9 = vld [vmem:[#allocation3 + $0x8] sm:$0xff] }
  0x94   :  { %42 = vadd.xlane.f32.xlu1 %v41_v11  ;;  %v187_v11 = vld [vmem:[#allocation3] sm:$0xff] }
  0x95   :  { %v40_v12 = vmul.f32 %v38_v10, %v38_v10 }
  0x97   :  { %v44_v13 = vsel %vm27_vm0, %v40_v12, 0.0 }
  0x98   :  { %45 = vadd.xlane.f32.xlu1 %v44_v13 }
 0x11d   :  { %v43_v23 = vpop.xlane.xlu1 %42 }
 0x11e   :  { %v47_v24 = vmul.f32 0.03125, %v43_v23 }
 0x120   :  { %v49_v25 = vadd.f32 1e-05, %v47_v24 }
 0x121   :  { %v46_v26 = vpop.xlane.xlu1 %45 }
 0x122   :  { %370 = vrsqrt.f32 %v49_v25  ;;  %v48_v27 = vmul.f32 0.03125, %v46_v26 }
 0x124   :  { %v50_v28 = vadd.f32 1e-05, %v48_v27 }
 0x126   :  { %372 = vrsqrt.f32 %v50_v28 }
 0x12f   :  { %v371_v29 = vpop.eup %370 }
 0x130   :  { %v53_v31 = vmul.f32 %v371_v29, %v37_v6 }
 0x132   :  { %v62_v33 = vmul.f32 %v307_v30, %v53_v31 }
 0x133   :  { %v373_v34 = vpop.eup %372 }
 0x134   :  { %v71_v35 = vadd.f32 %v308_v32, %v62_v33  ;;  %v54_v36 = vmul.f32 %v373_v34, %v38_v10 }
 0x136   :  { %73 = vst.msk [vmem:[#allocation2] sm:$0xff] %vm27_vm0, %v71_v35  ;;  %v63_v37 = vmul.f32 %v307_v30, %v54_v36 }
 0x138   :  { %v72_v38 = vadd.f32 %v308_v32, %v63_v37 }
 0x13a   :  { %74 = vst.msk [vmem:[#allocation2 + $0x8] sm:$0xff] %vm27_vm0, %v72_v38 }
 0x13d   :  { %v77_v39 = vld [vmem:[#allocation2] sm:$0xff] }
 0x13e   :  { %309 = vmatmul.mubr.msk.f32.vlgmr.msra.gmra.mxu0 %vm27_vm0, %v77_v39 }
 0x13f   :  { %164 = vmatprep.mubr.f32.mxu0 %v404_v22 }
 0x141   :  { %v78_v40 = vld [vmem:[#allocation2 + $0x8] sm:$0xff] }
 0x142   :  { %310 = vmatmul.mubr.msk.f32.gmra.mxu0 %vm27_vm0, %v78_v40 }
 0x1fe   :  { %v160_v57 = vpop.f32.mrf.mxu0 }
 0x1ff   :  { %v311_v58 = vmul.f32 -1.442695, %v160_v57 }
 0x200   :  { %v162_v59 = vpop.f32.mrf.mxu0 }
 0x201   :  { %374 = vpow2.f32 %v311_v58 }
 0x202   :  { %v166_v60 = vpop.f32.mrf.mxu0 }
 0x203   :  { %v312_v61 = vmul.f32 -1.442695, %v166_v60 }
 0x204   :  { %v168_v7 = vpop.f32.mrf.mxu0 }
 0x205   :  { %376 = vpow2.f32 %v312_v61 }
 0x20e   :  { %v375_v62 = vpop.eup %374 }
 0x20f   :  { %v177_v63 = vadd.f32 1.0, %v375_v62 }
 0x211   :  { %378 = vrcp.f32 %v177_v63 }
 0x212   :  { %v377_v0 = vpop.eup %376 }
 0x213   :  { %v178_v1 = vadd.f32 1.0, %v377_v0 }
 0x215   :  { %380 = vrcp.f32 %v178_v1 }
 0x21e   :  { %v379_v2 = vpop.eup %378 }
 0x21f   :  { %v183_v3 = vmul.f32 %v379_v2, %v160_v57 }
 0x221   :  { %v185_v4 = vmul.f32 %v183_v3, %v162_v59 }
 0x222   :  { %v381_v5 = vpop.eup %380 }
 0x223   :  { %v184_v6 = vmul.f32 %v381_v5, %v166_v60  ;;  %363 = vmatprep.mubr.f32.mxu1 %v185_v4 }
 0x225   :  { %v186_v8 = vmul.f32 %v184_v6, %v168_v7 }
 0x227   :  { %364 = vmatmul.mubr.f32.vlgmr.msra.gmra.mxu1 %v186_v8 }
 0x2e7   :  { %v365_v10 = vpop.f32.mrf.mxu1 }
 0x2e8   :  { %v281_v12 = vadd.f32 %v365_v10, %v188_v9 }
 0x2e9   :  { %v271_v13 = vpop.f32.mrf.mxu1 }
 0x2ea   :  { %283 = vst.msk [vmem:[#allocation3 + $0x8] sm:$0xff] %vm27_vm0, %v281_v12  ;;  %v280_v14 = vadd.f32 %v271_v13, %v187_v11 }
 0x2ec   :  { %282 = vst.msk [vmem:[#allocation3] sm:$0xff] %vm27_vm0, %v280_v14 }
 0x2f1   :  { %v288_v15 = vld [vmem:[#allocation3 + $0x8] sm:$0xff] }
 0x2f2   :  { %290 = vst.msk [vmem:[#allocation4 + $0x8] sm:$0xff] %vm27_vm0, %v288_v15 }
 0x2f3   :  { %v287_v16 = vld [vmem:[#allocation3] sm:$0xff] }
 0x2f4   :  { %289 = vst.msk [vmem:[#allocation4] sm:$0xff] %vm27_vm0, %v287_v16 }
 0x2f5   :  { %393 = shalt.err (!%p390_p4)
}
 0x2f6   :  { %s406_s18 = smov 128   ;;  %s407_s19 = smov 8  }
 0x2f7   :  { %302 = dma.vmem_to_hbm [thread:$0]  %s297_s16, 256, %s544_s5, [#allocation5], %s406_s18, %s406_s18, %s407_s19  }
 0x2f8   :  { %402 = dma.done.wait [#allocation5], 256  }
 0x2f9   :  { %403 = vsyncadd [#allocation5], 4294967040 }
 0x2fa   :  { %306 = vsyncpa [#allocation5], 1 }

</bundles_post_ra>
